<compile_context>
chip_gen: v7x
topology: tpu7x:2x2x1
jax: 0.10.0
libtpu: 0.0.40
codegen_flags: <defaults>
</compile_context>

<pallas_src>
import jax
import jax.numpy as jnp
from jax.experimental import pallas as pl
from jax.experimental.pallas import tpu as pltpu

_SMALL_B = 512       # at or below this: single-shot, no-grid path
_MAX_TILE_B = 4096   # upper bound on the batch tile for the gridded path


def _round_up(n, m):
    return ((n + m - 1) // m) * m


def _mlp_kernel(x_ref, w1_ref, b1_ref, w2_ref, b2_ref, o_ref):
    # fc1: [B, In] @ [In, H] on the MXU, f32 accumulation.
    h = jnp.dot(x_ref[...], w1_ref[...],
                preferred_element_type=jnp.float32,
                precision=jax.lax.Precision.HIGHEST)
    # bias + ReLU on the VPU.
    h = jnp.maximum(h + b1_ref[...], 0.0)
    # fc2: [B, H] @ [H, C].
    out = jnp.dot(h, w2_ref[...],
                  preferred_element_type=jnp.float32,
                  precision=jax.lax.Precision.HIGHEST)
    o_ref[...] = (out + b2_ref[...]).astype(o_ref.dtype)


def neural_net_forward(x, w1, b1, w2, b2):
    """Fused forward pass of NeuralNet.

    x  : [B, input_size]
    w1 : [input_size, hidden_size]   (PyTorch fc1.weight.T)
    b1 : [1, hidden_size]
    w2 : [hidden_size, num_classes]  (PyTorch fc2.weight.T)
    b2 : [1, num_classes]
    returns [B, num_classes]
    """
    B, In = x.shape
    H = w1.shape[1]
    C = w2.shape[1]
    out_dtype = x.dtype

    cost = pl.CostEstimate(
        flops=2 * B * (In * H + H * C),
        transcendentals=0,
        bytes_accessed=4 * (B * In + In * H + H + H * C + C + B * C),
    )

    if B <= _SMALL_B:
        # Single-tile case: no grid -> no pipeline prologue/epilogue and no
        # double-buffer VMEM; everything is resident for the whole kernel.
        return pl.pallas_call(
            _mlp_kernel,
            out_shape=jax.ShapeDtypeStruct((B, C), out_dtype),
            in_specs=[pl.BlockSpec(memory_space=pltpu.MemorySpace.VMEM)] * 5,
            out_specs=pl.BlockSpec(memory_space=pltpu.MemorySpace.VMEM),
            cost_estimate=cost,
        )(x, w1, b1, w2, b2)

    # Batched case: tile only the batch axis; weights/biases are VMEM-resident
    # across the grid (index_map always returns block (0, 0)).  Tile is large
    # (amortizes ~0.35-0.6 us/step overhead) but capped so the "parallel"
    # batch axis always has >= 2 steps for v7x dual-TensorCore sharding.
    tile_b = min(_MAX_TILE_B, _round_up(pl.cdiv(B, 2), 512))
    grid = pl.cdiv(B, tile_b)   # ragged last block handled by Pallas masking
    return pl.pallas_call(
        _mlp_kernel,
        out_shape=jax.ShapeDtypeStruct((B, C), out_dtype),
        grid_spec=pltpu.PrefetchScalarGridSpec(
            num_scalar_prefetch=0,
            grid=(grid,),
            in_specs=[
                pl.BlockSpec((tile_b, In), lambda i: (i, 0)),
                pl.BlockSpec((In, H), lambda i: (0, 0)),
                pl.BlockSpec((1, H), lambda i: (0, 0)),
                pl.BlockSpec((H, C), lambda i: (0, 0)),
                pl.BlockSpec((1, C), lambda i: (0, 0)),
            ],
            out_specs=pl.BlockSpec((tile_b, C), lambda i: (i, 0)),
        ),
        compiler_params=pltpu.CompilerParams(
            dimension_semantics=("parallel",),
            vmem_limit_bytes=32 * 1024 * 1024,  # explicit: v5e default is 16 MiB
        ),
        cost_estimate=cost,
    )(x, w1, b1, w2, b2)


if __name__ == "__main__":
    # Module hyperparameters (small, consistent with the Linear layers).
    batch = 8
    input_size = 32
    hidden_size = 64
    num_classes = 16

    key = jax.random.PRNGKey(0)
    kx, k1, kb1, k2, kb2 = jax.random.split(key, 5)

    x = jax.random.normal(kx, (batch, input_size), dtype=jnp.float32)

    # Deterministic parameter init (uniform, like PyTorch Linear default scale).
    bound1 = 1.0 / (input_size ** 0.5)
    w1 = jax.random.uniform(k1, (input_size, hidden_size),
                            minval=-bound1, maxval=bound1, dtype=jnp.float32)
    b1 = jax.random.uniform(kb1, (1, hidden_size),
                            minval=-bound1, maxval=bound1, dtype=jnp.float32)

    bound2 = 1.0 / (hidden_size ** 0.5)
    w2 = jax.random.uniform(k2, (hidden_size, num_classes),
                            minval=-bound2, maxval=bound2, dtype=jnp.float32)
    b2 = jax.random.uniform(kb2, (1, num_classes),
                            minval=-bound2, maxval=bound2, dtype=jnp.float32)

    def ref_fn(xx):
        h = jnp.dot(xx, w1, precision=jax.lax.Precision.HIGHEST) + b1
        h = jnp.maximum(h, 0.0)
        return jnp.dot(h, w2, precision=jax.lax.Precision.HIGHEST) + b2

    # 1) Small-batch path (no grid, fully VMEM-resident).
    out_small = jax.block_until_ready(neural_net_forward(x, w1, b1, w2, b2))
    assert out_small.shape == (batch, num_classes)
    assert jnp.allclose(out_small, ref_fn(x), atol=1e-4, rtol=1e-4)

    # 2) Batched path (batch-tiled grid, >=2 "parallel" steps, resident weights).
    big_batch = 1024
    xb = jax.random.normal(kx, (big_batch, input_size), dtype=jnp.float32)
    out_big = jax.block_until_ready(neural_net_forward(xb, w1, b1, w2, b2))
    assert out_big.shape == (big_batch, num_classes)
    assert jnp.allclose(out_big, ref_fn(xb), atol=1e-4, rtol=1e-4)

    print("KERNEL_OK")
</pallas_src>

<mosaic_0001>
module attributes {stable_mosaic.version = 11 : i64} {
  func.func @_mlp_kernel(%arg0: memref<8x32xf32, #tpu.memory_space<vmem>>, %arg1: memref<32x64xf32, #tpu.memory_space<vmem>>, %arg2: memref<1x64xf32, #tpu.memory_space<vmem>>, %arg3: memref<64x16xf32, #tpu.memory_space<vmem>>, %arg4: memref<1x16xf32, #tpu.memory_space<vmem>>, %arg5: memref<8x16xf32, #tpu.memory_space<vmem>>) attributes {dimension_semantics = [], scalar_prefetch = 0 : i64, scratch_operands = 0 : i64, tpu.core_type = #tpu.core_type<tc>} {
    %c0 = arith.constant 0 : index
    %c0_0 = arith.constant 0 : index
    %0 = vector.load %arg0[%c0, %c0_0] : memref<8x32xf32, #tpu.memory_space<vmem>>, vector<8x32xf32>
    %c0_1 = arith.constant 0 : index
    %c0_2 = arith.constant 0 : index
    %1 = vector.load %arg1[%c0_1, %c0_2] : memref<32x64xf32, #tpu.memory_space<vmem>>, vector<32x64xf32>
    %cst = arith.constant dense<0.000000e+00> : vector<8x64xf32>
    %2 = tpu.matmul %0, %1, %cst {dimension_numbers = #tpu.dot_dimension_numbers<[1], [0], [0], [1], [0, 0, 1, 1], [], []>, precision = #tpu.contract_precision<fp32>} : vector<8x32xf32>, vector<32x64xf32>, vector<8x64xf32> -> vector<8x64xf32>
    %c0_3 = arith.constant 0 : index
    %c0_4 = arith.constant 0 : index
    %3 = vector.load %arg2[%c0_3, %c0_4] : memref<1x64xf32, #tpu.memory_space<vmem>>, vector<1x64xf32>
    %4 = vector.broadcast %3 : vector<1x64xf32> to vector<8x64xf32>
    %5 = arith.addf %2, %4 : vector<8x64xf32>
    %cst_5 = arith.constant 0.000000e+00 : f32
    %6 = vector.broadcast %cst_5 : f32 to vector<8x64xf32>
    %7 = arith.maximumf %5, %6 : vector<8x64xf32>
    %c0_6 = arith.constant 0 : index
    %c0_7 = arith.constant 0 : index
    %8 = vector.load %arg3[%c0_6, %c0_7] : memref<64x16xf32, #tpu.memory_space<vmem>>, vector<64x16xf32>
    %cst_8 = arith.constant dense<0.000000e+00> : vector<8x16xf32>
    %9 = tpu.matmul %7, %8, %cst_8 {dimension_numbers = #tpu.dot_dimension_numbers<[1], [0], [0], [1], [0, 0, 1, 1], [], []>, precision = #tpu.contract_precision<fp32>} : vector<8x64xf32>, vector<64x16xf32>, vector<8x16xf32> -> vector<8x16xf32>
    %c0_9 = arith.constant 0 : index
    %c0_10 = arith.constant 0 : index
    %10 = vector.load %arg4[%c0_9, %c0_10] : memref<1x16xf32, #tpu.memory_space<vmem>>, vector<1x16xf32>
    %11 = vector.broadcast %10 : vector<1x16xf32> to vector<8x16xf32>
    %12 = arith.addf %9, %11 : vector<8x16xf32>
    %c0_11 = arith.constant 0 : index
    %c0_12 = arith.constant 0 : index
    %13 = vector.load %arg5[%c0_11, %c0_12] : memref<8x16xf32, #tpu.memory_space<vmem>>, vector<8x16xf32>
    tpu.vector_store %arg5[%c0_11, %c0_12], %12 {strides = array<i32>} : memref<8x16xf32, #tpu.memory_space<vmem>>, vector<8x16xf32>,
    return
  }
}

</mosaic_0001>

<bundles_post_ra>
// kernel: tpu_custom_call.1
= control target key start
LH: loop header
LB: loop body
LE: loop exit
PB: predicated region body
PF: predicated region fallthrough
CT: control target
= control target key end

     0   :  { %v1518_v3 = vmov 0.0|0.0   ;;  %vm1519_vm0 = vmmov 0   ;;  %v1520_v8 = vmov 0.0   ;;  %vm33_vm1 = vcmask 261120   ;;  %s1804_s0 = inlined_call_operand.vmem [shape: f32[8,32], index: 0, kind: input, shape index: {}]   ;;  %s1805_s1 = inlined_call_operand.vmem [shape: f32[32,64], index: 1, kind: input, shape index: {}]   ;;  %s1806_s2 = inlined_call_operand.vmem [shape: f32[1,64], index: 2, kind: input, shape index: {}]   ;;  %s1807_s3 = inlined_call_operand.vmem [shape: f32[64,16], index: 3, kind: input, shape index: {}]   ;;  %s1808_s4 = inlined_call_operand.vmem [shape: f32[1,16], index: 4, kind: input, shape index: {}]   ;;  %s1809_s5 = inlined_call_operand.hbm [shape: f32[8,16], index: 5, kind: output, shape index: {}]  }
   0x1   :  { %v22_v0 = vld [vmem:[%s1805_s1] sm:$0xff]  ;;  %v23_v1 = vld [vmem:[%s1805_s1 + $0x8] sm:$0xff]  ;;  %v24_v2 = vld [vmem:[%s1805_s1 + $0x10] sm:$0xff]  ;;  %1361 = vmatprep.subr.bf16.mxu0 %v1518_v3  ;;  %1189 = vmatprep.mubr.msk.f32.mxu0 %vm1519_vm0, %v1520_v8 }
   0x2   :  { %v38_v4 = vand.u32 4294901760, %v22_v0  ;;  %v41_v5 = vand.u32 4294901760, %v23_v1  ;;  %v25_v6 = vld [vmem:[%s1805_s1 + $0x18] sm:$0xff]  ;;  %v44_v7 = vand.u32 4294901760, %v24_v2  ;;  %v21_v9 = vld [vmem:[%s1804_s0] sm:$0xff]  ;;  %1409 = vmatprep.subr.bf16.mxu1 %v1518_v3  ;;  %1282 = vmatprep.mubr.msk.f32.mxu1 %vm1519_vm0, %v1520_v8  ;;  %v1589_v17 = vld [vmem:[%s1807_s3 + $0x8] sm:$0xff] }
   0x3   :  { %v47_v10 = vand.u32 4294901760, %v25_v6  ;;  %v35_v11 = vsel %vm33_vm1, %v21_v9, 0  ;;  %v1574_v12 = vld [vmem:[%s1807_s3] sm:$0xff] }
   0x4   :  { %v1578_v13 = vpack.c.bf16 %v41_v5, %v38_v4  ;;  %v1580_v14 = vsub.f32 %v22_v0, %v38_v4  ;;  %v1582_v15 = vsub.f32 %v23_v1, %v41_v5  ;;  %v1584_v16 = vsub.f32 %v24_v2, %v44_v7 }
   0x5   :  { %10 = vsyncpa [#allocation3], 0  ;;  %v1591_v18 = vsub.f32 %v25_v6, %v47_v10  ;;  %v1593_v19 = vand.u32 4294901760, %v35_v11  ;;  %v543_v20 = vand.u32 4294901760, %v1574_v12  ;;  %v1597_v21 = vpack.c.bf16 %v47_v10, %v44_v7  ;;  %v1620_v31 = vld [vmem:[%s1807_s3 + $0x10] sm:$0xff]  ;;  %v1634_v35 = vld [vmem:[%s1807_s3 + $0x18] sm:$0xff] }
   0x6   :  { %1363 = vmatpush3.bf16.msra.mxu0 %v1578_v13  ;;  %v119_v22 = vand.u32 4294901760, %v1580_v14  ;;  %v126_v23 = vand.u32 4294901760, %v1582_v15  ;;  %v133_v24 = vand.u32 4294901760, %v1584_v16  ;;  %v546_v27 = vand.u32 4294901760, %v1589_v17  ;;  %v527_v4 = vld [vmem:[%s1807_s3 + $0x20] sm:$0xff]  ;;  %v528_v5 = vld [vmem:[%s1807_s3 + $0x28] sm:$0xff] }
   0x7   :  { %1364 = vmatprep.subr.bf16.mxu0 %v1518_v3  ;;  %v1604_v25 = vsub.f32 %v35_v11, %v1593_v19  ;;  %v140_v26 = vand.u32 4294901760, %v1591_v18  ;;  %v1629_v34 = vsub.f32 %v1574_v12, %v543_v20  ;;  %v549_v42 = vand.u32 4294901760, %v1620_v31  ;;  %v529_v11 = vld [vmem:[%s1807_s3 + $0x30] sm:$0xff]  ;;  %s1521_s19 = smov [#allocation2]  }
   0x8   :  { %v120_v28 = vsub.f32 %v1580_v14, %v119_v22  ;;  %v127_v29 = vsub.f32 %v1582_v15, %v126_v23  ;;  %v134_v30 = vsub.f32 %v1584_v16, %v133_v24  ;;  %v1640_v38 = vsub.f32 %v1589_v17, %v546_v27  ;;  %s1087_s20 = sshll.u32 %s1521_s19, 4  ;;  %s1088_s20 = int_to_ptr.vmem [resolvable:$true] %s1087_s20 }
   0x9   :  { %v108_v32 = vand.u32 4294901760, %v1604_v25  ;;  %v141_v33 = vsub.f32 %v1591_v18, %v140_v26  ;;  %v628_v41 = vand.u32 4294901760, %v1629_v34  ;;  %v552_v46 = vand.u32 4294901760, %v1634_v35  ;;  %s1494_s21 = scalar_lea.vmem %s1088_s20, 128  ;;  %p1499_p1 = scmp.lt.s32.totalorder %s1088_s20, %s1088_s20 }
   0xa   :  { %1366 = vmatpush3.bf16.msra.mxu0 %v1597_v21  ;;  %v121_v36 = vand.u32 4294901760, %v120_v28  ;;  %v128_v37 = vand.u32 4294901760, %v127_v29  ;;  %v135_v40 = vand.u32 4294901760, %v134_v30  ;;  %v635_v45 = vand.u32 4294901760, %v1640_v38  ;;  %p1495_p0 = scmp.ne.s32.totalorder %s1088_s20, %s1494_s21  ;;  %p1500_p2 = scmp.lt.s32.totalorder %s1494_s21, %s1494_s21 }
   0xb   :  { %v109_v39 = vsub.f32 %v1604_v25, %v108_v32  ;;  %1367 = vmatprep.subr.bf16.mxu0 %v1518_v3  ;;  %v142_v44 = vand.u32 4294901760, %v141_v33  ;;  %v629_v48 = vsub.f32 %v1629_v34, %v628_v41  ;;  %v1654_v49 = vsub.f32 %v1620_v31, %v549_v42 }
   0xc   :  { %v1368_v43 = vpack.c.bf16 %v128_v37, %v121_v36  ;;  %v636_v50 = vsub.f32 %v1640_v38, %v635_v45  ;;  %v1662_v51 = vsub.f32 %v1634_v35, %v552_v46  ;;  %v1374_v61 = vpack.c.bf16 %v1582_v15, %v1580_v14  ;;  %v1095_v35 = vld [vmem:[%s1806_s2] ss:$0 sm:$0xff]  ;;  %p1501_p3 = por %p1500_p2, %p1499_p1 }
   0xd   :  { %v110_v47 = vand.u32 4294901760, %v109_v39  ;;  %v630_v52 = vand.u32 4294901760, %v629_v48  ;;  %v642_v53 = vand.u32 4294901760, %v1654_v49  ;;  %v1371_v54 = vpack.c.bf16 %v142_v44, %v135_v40 }
   0xe   :  { %v637_v55 = vand.u32 4294901760, %v636_v50  ;;  %v649_v56 = vand.u32 4294901760, %v1662_v51  ;;  %v1377_v0 = vpack.c.bf16 %v1591_v18, %v1584_v16  ;;  %v1386_v1 = vpack.c.bf16 %v126_v23, %v119_v22  ;;  %p1502_p4 = pnand %p1501_p3, %p1495_p0 }
   0xf   :  { %1190 = vmatmul.mubr.f32.vlgmr.msra.gmra.mrb[0].mxu0 %v110_v47  ;;  %v643_v57 = vsub.f32 %v1654_v49, %v642_v53  ;;  %v1389_v2 = vpack.c.bf16 %v140_v26, %v133_v24  ;;  %v555_v6 = vand.u32 4294901760, %v527_v4  ;;  %v558_v7 = vand.u32 4294901760, %v528_v5 }
  0x10   :  { %1369 = vmatpush3.bf16.msra.mxu0 %v1368_v43  ;;  %1200 = vmatprep.mubr.msk.f32.mxu0 %vm1519_vm0, %v1520_v8  ;;  %v1410_v58 = vpack.c.bf16 %v637_v55, %v630_v52  ;;  %v650_v59 = vsub.f32 %v1662_v51, %v649_v56  ;;  %v561_v16 = vand.u32 4294901760, %v529_v11  ;;  %v1732_v33 = vpack.c.bf16 %v546_v27, %v543_v20 }
  0x11   :  { %1370 = vmatprep.subr.bf16.mxu0 %v1518_v3  ;;  %v644_v60 = vand.u32 4294901760, %v643_v57  ;;  %v655_v9 = vsub.f32 %v527_v4, %v555_v6  ;;  %v662_v10 = vsub.f32 %v528_v5, %v558_v7  ;;  %v1741_v40 = vpack.c.bf16 %v552_v46, %v549_v42 }
  0x12   :  { %1411 = vmatpush3.bf16.msra.mxu1 %v1410_v58  ;;  %v651_v62 = vand.u32 4294901760, %v650_v59  ;;  %v669_v22 = vsub.f32 %v529_v11, %v561_v16  ;;  %v1404_v12 = vpack.c.bf16 %v558_v7, %v555_v6  ;;  %vm538_vm2 = vcmask 523264  }
  0x13   :  { %1412 = vmatprep.subr.bf16.mxu1 %v1518_v3  ;;  %v656_v14 = vand.u32 4294901760, %v655_v9  ;;  %v663_v15 = vand.u32 4294901760, %v662_v10  ;;  %v1428_v20 = vpack.c.bf16 %v662_v10, %v655_v9  ;;  %v1422_v50 = vpack.c.bf16 %v1640_v38, %v1629_v34 }
  0x14   :  { %1372 = vmatpush3.bf16.msra.mxu0 %v1371_v54  ;;  %v1413_v63 = vpack.c.bf16 %v651_v62, %v644_v60  ;;  %v670_v26 = vand.u32 4294901760, %v669_v22  ;;  %v1425_v55 = vpack.c.bf16 %v1662_v51, %v1654_v49  ;;  %v1446_v60 = vpack.c.bf16 %v635_v45, %v628_v41  ;;  %v1096_v41 = vld [vmem:[%s1808_s4] ss:$0 sm:$0xff] }
  0x15   :  { %1373 = vmatprep.subr.bf16.mxu0 %v1518_v3  ;;  %v1452_v31 = vpack.c.bf16 %v663_v15, %v656_v14  ;;  %vm1079_vm3 = vcmask 130048  }
  0x16   :  { %1414 = vmatpush3.bf16.msra.mxu1 %v1413_v63  ;;  %v671_v30 = vsub.f32 %v669_v22, %v670_v26 }
  0x17   :  { %1201 = vmatmul.mubr.f32.vlgmr.msra.gmra.mrb[0].mxu0 %v1593_v19  ;;  %1415 = vmatprep.subr.bf16.mxu1 %v1518_v3 }
  0x18   :  { %1375 = vmatpush3.bf16.msra.mxu0 %v1374_v61  ;;  %1211 = vmatprep.mubr.msk.f32.mxu0 %vm1519_vm0, %v1520_v8  ;;  %v672_v36 = vand.u32 4294901760, %v671_v30  ;;  %v1449_v61 = vpack.c.bf16 %v649_v56, %v642_v53 }
  0x19   :  { %1376 = vmatprep.subr.bf16.mxu0 %v1518_v3 }
  0x1c   :  { %1378 = vmatpush3.bf16.msra.mxu0 %v1377_v0 }
  0x1d   :  { %1379 = vmatprep.subr.bf16.mxu0 %v1518_v3 }
  0x1f   :  { %1212 = vmatmul.mubr.f32.vlgmr.msra.gmra.mrb[0].mxu0 %v1604_v25 }
  0x20   :  { %1381 = vmatpush3.bf16.msra.mxu0 %v1578_v13  ;;  %1222 = vmatprep.mubr.msk.f32.mxu0 %vm1519_vm0, %v1520_v8 }
  0x21   :  { %1382 = vmatprep.subr.bf16.mxu0 %v1518_v3 }
  0x24   :  { %1384 = vmatpush3.bf16.msra.mxu0 %v1597_v21 }
  0x25   :  { %1385 = vmatprep.subr.bf16.mxu0 %v1518_v3 }
  0x27   :  { %1223 = vmatmul.mubr.f32.vlgmr.msra.gmra.mrb[0].mxu0 %v108_v32 }
  0x28   :  { %1387 = vmatpush3.bf16.msra.mxu0 %v1386_v1  ;;  %1233 = vmatprep.mubr.msk.f32.mxu0 %vm1519_vm0, %v1520_v8 }
  0x29   :  { %1388 = vmatprep.subr.bf16.mxu0 %v1518_v3 }
  0x2c   :  { %1390 = vmatpush3.bf16.msra.mxu0 %v1389_v2 }
  0x2d   :  { %1391 = vmatprep.subr.bf16.mxu0 %v1518_v3 }
  0x2f   :  { %1234 = vmatmul.mubr.f32.vlgmr.msra.gmra.mrb[0].mxu0 %v1593_v19 }
  0x30   :  { %1393 = vmatpush3.bf16.msra.mxu0 %v1578_v13  ;;  %1244 = vmatprep.mubr.msk.f32.mxu0 %vm1519_vm0, %v1520_v8  ;;  %v530_v13 = vld [vmem:[%s1807_s3 + $0x38] sm:$0xff] }
  0x31   :  { %1394 = vmatprep.subr.bf16.mxu0 %v1518_v3  ;;  %v564_v18 = vand.u32 4294901760, %v530_v13 }
  0x33   :  { %v676_v23 = vsub.f32 %v530_v13, %v564_v18  ;;  %v1407_v17 = vpack.c.bf16 %v564_v18, %v561_v16 }
  0x34   :  { %1396 = vmatpush3.bf16.msra.mxu0 %v1597_v21  ;;  %v664_v21 = vsub.f32 %v662_v10, %v663_v15 }
  0x35   :  { %1397 = vmatprep.subr.bf16.mxu0 %v1518_v3  ;;  %v677_v28 = vand.u32 4294901760, %v676_v23  ;;  %v1431_v27 = vpack.c.bf16 %v676_v23, %v669_v22 }
  0x36   :  { %v665_v25 = vand.u32 4294901760, %v664_v21 }
  0x37   :  { %1245 = vmatmul.mubr.f32.vlgmr.msra.gmra.mrb[0].mxu0 %v1593_v19  ;;  %v657_v19 = vsub.f32 %v655_v9, %v656_v14  ;;  %v678_v32 = vsub.f32 %v676_v23, %v677_v28  ;;  %v1455_v43 = vpack.c.bf16 %v677_v28, %v670_v26 }
  0x38   :  { %1263 = vmatprep.mubr.msk.f32.mxu0 %vm1519_vm0, %v1520_v8  ;;  %1399 = vmatpush3.bf16.msra.mxu0 %v1732_v33 }
  0x39   :  { %v658_v24 = vand.u32 4294901760, %v657_v19  ;;  %v679_v37 = vand.u32 4294901760, %v678_v32  ;;  %1400 = vmatprep.subr.bf16.mxu0 %v1518_v3 }
  0x3b   :  { %v1416_v29 = vpack.c.bf16 %v665_v25, %v658_v24  ;;  %v1419_v39 = vpack.c.bf16 %v679_v37, %v672_v36 }
  0x3c   :  { %1402 = vmatpush3.bf16.msra.mxu0 %v1741_v40 }
  0x3d   :  { %1417 = vmatpush3.bf16.msra.mxu1 %v1416_v29  ;;  %1403 = vmatprep.subr.bf16.mxu0 %v1518_v3 }
  0x3e   :  { %1418 = vmatprep.subr.bf16.mxu1 %v1518_v3 }
  0x40   :  { %1405 = vmatpush3.bf16.msra.mxu0 %v1404_v12 }
  0x41   :  { %1420 = vmatpush3.bf16.msra.mxu1 %v1419_v39  ;;  %1406 = vmatprep.subr.bf16.mxu0 %v1518_v3 }
  0x42   :  { %1421 = vmatprep.subr.bf16.mxu1 %v1518_v3 }
  0x44   :  { %1408 = vmatpush3.bf16.msra.mxu0 %v1407_v17 }
 0x10a   :  { %v518_v42 = vpop.f32.mrb[0].mxu0 }
 0x10b   :  { %v1469_v44 = vadd.f32 %v1095_v35, %v518_v42  ;;  %v1246_v46 = vpop.f32.mrb[1].mxu0 }
 0x10d   :  { %v522_v47 = vmax.f32 %v1469_v44, 0.0 }
 0x10f   :  { %v540_v48 = vsel %vm538_vm2, %v522_v47, 0 }
 0x110   :  { %v615_v52 = vand.u32 4294901760, %v540_v48 }
 0x112   :  { %v616_v54 = vsub.f32 %v540_v48, %v615_v52  ;;  %1283 = vmatmul.mubr.f32.vlgmr.msra.gmra.mrb[0].mxu1 %v615_v52 }
 0x113   :  { %1423 = vmatpush3.bf16.msra.mxu1 %v1422_v50  ;;  %1301 = vmatprep.mubr.msk.f32.mxu1 %vm1519_vm0, %v1520_v8 }
 0x114   :  { %v617_v57 = vand.u32 4294901760, %v616_v54  ;;  %1424 = vmatprep.subr.bf16.mxu1 %v1518_v3 }
 0x116   :  { %v618_v58 = vsub.f32 %v616_v54, %v617_v57 }
 0x117   :  { %1426 = vmatpush3.bf16.msra.mxu1 %v1425_v55 }
 0x118   :  { %1427 = vmatprep.subr.bf16.mxu1 %v1518_v3  ;;  %v619_v59 = vand.u32 4294901760, %v618_v58 }
 0x11a   :  { %1264 = vmatmul.mubr.f32.vlgmr.msra.gmra.mrb[2].mxu0 %v619_v59 }
 0x11b   :  { %1429 = vmatpush3.bf16.msra.mxu1 %v1428_v20 }
 0x11c   :  { %1430 = vmatprep.subr.bf16.mxu1 %v1518_v3 }
 0x11f   :  { %1432 = vmatpush3.bf16.msra.mxu1 %v1431_v27 }
 0x120   :  { %1433 = vmatprep.subr.bf16.mxu1 %v1518_v3 }
 0x122   :  { %1302 = vmatmul.mubr.f32.vlgmr.msra.gmra.mrb[0].mxu1 %v616_v54 }
 0x123   :  { %1435 = vmatpush3.bf16.msra.mxu1 %v1732_v33  ;;  %1320 = vmatprep.mubr.msk.f32.mxu1 %vm1519_vm0, %v1520_v8 }
 0x124   :  { %1436 = vmatprep.subr.bf16.mxu1 %v1518_v3 }
 0x127   :  { %1438 = vmatpush3.bf16.msra.mxu1 %v1741_v40 }
 0x128   :  { %1439 = vmatprep.subr.bf16.mxu1 %v1518_v3 }
 0x12b   :  { %1441 = vmatpush3.bf16.msra.mxu1 %v1404_v12 }
 0x12c   :  { %1442 = vmatprep.subr.bf16.mxu1 %v1518_v3 }
 0x12f   :  { %1444 = vmatpush3.bf16.msra.mxu1 %v1407_v17 }
 0x130   :  { %1445 = vmatprep.subr.bf16.mxu1 %v1518_v3 }
 0x132   :  { %1321 = vmatmul.mubr.f32.vlgmr.msra.gmra.mrb[0].mxu1 %v617_v57 }
 0x133   :  { %1447 = vmatpush3.bf16.msra.mxu1 %v1446_v60  ;;  %1339 = vmatprep.mubr.msk.f32.mxu1 %vm1519_vm0, %v1520_v8 }
 0x134   :  { %1448 = vmatprep.subr.bf16.mxu1 %v1518_v3 }
 0x137   :  { %1450 = vmatpush3.bf16.msra.mxu1 %v1449_v61 }
 0x138   :  { %1451 = vmatprep.subr.bf16.mxu1 %v1518_v3 }
 0x13b   :  { %1453 = vmatpush3.bf16.msra.mxu1 %v1452_v31 }
 0x13c   :  { %1454 = vmatprep.subr.bf16.mxu1 %v1518_v3 }
 0x13f   :  { %1456 = vmatpush3.bf16.msra.mxu1 %v1455_v43 }
 0x140   :  { %1457 = vmatprep.subr.bf16.mxu1 %v1518_v3 }
 0x142   :  { %1340 = vmatmul.mubr.f32.vlgmr.msra.gmra.mrb[0].mxu1 %v615_v52 }
 0x143   :  { %1459 = vmatpush3.bf16.msra.mxu1 %v1732_v33  ;;  %1358 = vmatprep.mubr.msk.f32.mxu1 %vm1519_vm0, %v1520_v8 }
 0x144   :  { %1460 = vmatprep.subr.bf16.mxu1 %v1518_v3 }
 0x147   :  { %1462 = vmatpush3.bf16.msra.mxu1 %v1741_v40 }
 0x148   :  { %1463 = vmatprep.subr.bf16.mxu1 %v1518_v3 }
 0x14b   :  { %1465 = vmatpush3.bf16.msra.mxu1 %v1404_v12 }
 0x14c   :  { %1466 = vmatprep.subr.bf16.mxu1 %v1518_v3 }
 0x14f   :  { %1468 = vmatpush3.bf16.msra.mxu1 %v1407_v17 }
 0x152   :  { %1359 = vmatmul.mubr.f32.vlgmr.msra.gmra.mrb[0].mxu1 %v615_v52 }
 0x1ed   :  { %v621_v34 = vpop.f32.mrb[2].mxu0 }
 0x1ee   :  { %v1265_v38 = vpop.f32.mrb[3].mxu0  ;;  %v622_v8 = vadd.f32 %v1096_v41, %v621_v34 }
 0x225   :  { %v1075_v45 = vpop.f32.mrb[0].mxu1 }
 0x226   :  { %v1471_v49 = vadd.f32 %v1075_v45, %v622_v8  ;;  %v1360_v51 = vpop.f32.mrb[1].mxu1 }
 0x228   :  { %1080 = vst.msk [vmem:[#allocation2] sm:$0xff] %vm1079_vm3, %v1471_v49 }
 0x229   :  { %1505 = shalt.err (!%p1502_p4)
}
 0x22a   :  { %s1506_s4 = scalar_lea.hbm %s1809_s5, 128 }
 0x22b   :  { %p1507_p5 = scmp.ne.s32.totalorder %s1809_s5, %s1506_s4  ;;  %p1510_p6 = scmp.lt.u32.totalorder %s1506_s4, %s1809_s5 }
 0x22d   :  { %p1512_p7 = pnand %p1510_p6, %p1507_p5 }
 0x22f   :  { %1515 = shalt.err (!%p1512_p7)
}
 0x230   :  { %1090 = dma.vmem_to_hbm [thread:$0]  %s1088_s20, 128, %s1809_s5, [#allocation3]  }
 0x231   :  { %1516 = dma.done.wait [#allocation3], 128  }
 0x232   :  { %1517 = vsyncadd [#allocation3], 4294967168 }
 0x233   :  { %1094 = vsyncpa [#allocation3], 1 }

</bundles_post_ra>
